<compile_context>
chip_gen: v5e
topology: v5e:2x2
jax: 0.10.0
libtpu: 0.0.40
codegen_flags: <defaults>
</compile_context>

<pallas_src>
import jax
import jax.numpy as jnp
from jax.experimental import pallas as pl
from jax.experimental.pallas import tpu as pltpu


def _round_up(x, m):
    return ((x + m - 1) // m) * m


def recommendation_mlp_kernel(
    x_ref, w1_ref, b1_ref, w2_ref, b2_ref, w3_ref, b3_ref, out_ref
):
    """One batch tile of the fused 3-layer MLP + sigmoid.

    x_ref is the wrapper-packed, lane-dense (TB, K_pad) bf16 feature block
    [ user | item | brand | price | desc_mean | zero-pad ]."""
    # fc1 + ReLU  (single K=K_pad bf16 MXU matmul, f32 accumulate)
    h1 = jnp.dot(x_ref[...], w1_ref[...], preferred_element_type=jnp.float32)
    h1 = jnp.maximum(h1 + b1_ref[...], 0.0)
    # TODO(synk): F.dropout(p=0.5) in the reference defaults to training=True
    # (stochastic mask + 1/(1-p) scaling); implemented as inference-mode identity.

    # fc2 + ReLU  (out dim zero-padded 64 -> 128 so vregs stay lane-dense)
    h2 = jnp.dot(h1.astype(w2_ref.dtype), w2_ref[...],
                 preferred_element_type=jnp.float32)
    h2 = jnp.maximum(h2 + b2_ref[...], 0.0)
    # TODO(synk): second dropout also treated as identity (inference mode).

    # fc3: N=1 output -> VPU multiply + lane reduction (no wasted MXU pass).
    logits = jnp.sum(h2 * w3_ref[...], axis=-1, keepdims=True) + b3_ref[...]
    out_ref[...] = jax.nn.sigmoid(logits)


def recommendation_forward(params, user, item, brand, price, description,
                           *, batch_tile=4096):
    """params: dict of tables / prepared weights. Integer ids are int32."""
    # --- glue: embedding lookups + desc mean + feature packing (plain JAX) ---
    # XLA fuses the gather and the mean; in-kernel per-row gathers would be
    # 32-64 B DMAs (far below efficient DMA granularity), so keep them here.
    uvec = jnp.take(params["user_emb"], user, axis=0)            # (B, E)  bf16
    ivec = jnp.take(params["item_emb"], item, axis=0)            # (B, E)  bf16
    bvec = jnp.take(params["brand_emb"], brand, axis=0)          # (B, E)  bf16
    demb = jnp.take(params["desc_emb"], description, axis=0)     # (B, L, D) bf16
    dmean = demb.astype(jnp.float32).mean(axis=1)                # (B, D)  f32

    B, E = uvec.shape
    D = dmean.shape[1]
    f_total = 3 * E + 1 + D
    K_pad = params["w1"].shape[0]                                # multiple of 128
    H1 = params["w1"].shape[1]                                   # 128
    H2 = params["w2"].shape[1]                                   # 128 (padded)

    # One lane-dense, zero-padded bf16 feature block (torch.cat order
    # [user | item | brand | price | desc_mean] + zero pad to K_pad lanes).
    x_packed = jnp.concatenate(
        [uvec, ivec, bvec,
         price.reshape(B, 1).astype(jnp.bfloat16),
         dmean.astype(jnp.bfloat16),
         jnp.zeros((B, K_pad - f_total), jnp.bfloat16)],
        axis=1)                                                   # (B, K_pad) bf16

    # Batch tile: multiple of 8 sublanes; aim for a >=2-step grid when B is
    # large so ("parallel",) can shard across both v7x TensorCores.
    TB = min(batch_tile, max(8, _round_up(pl.cdiv(B, 2), 8)))
    B_pad = _round_up(B, TB)
    if B_pad != B:
        x_packed = jnp.concatenate(
            [x_packed, jnp.zeros((B_pad - B, K_pad), jnp.bfloat16)], axis=0)
    grid = (B_pad // TB,)

    batch_map = lambda i: (i, 0)
    const_map = lambda i: (0, 0)        # weights stay VMEM-resident across steps

    grid_spec = pltpu.PrefetchScalarGridSpec(
        num_scalar_prefetch=0,
        grid=grid,
        in_specs=[
            pl.BlockSpec((TB, K_pad), batch_map),   # packed features (bf16)
            pl.BlockSpec((K_pad, H1), const_map),   # w1 (padded, bf16)
            pl.BlockSpec((1, H1), const_map),       # b1 (f32)
            pl.BlockSpec((H1, H2), const_map),      # w2 (padded, bf16)
            pl.BlockSpec((1, H2), const_map),       # b2 (padded, f32)
            pl.BlockSpec((1, H2), const_map),       # w3 as a row (padded, f32)
            pl.BlockSpec((1, 1), const_map),        # b3 (f32)
        ],
        out_specs=pl.BlockSpec((TB, 1), batch_map),
    )

    out = pl.pallas_call(
        recommendation_mlp_kernel,
        out_shape=jax.ShapeDtypeStruct((B_pad, 1), jnp.float32),
        grid_spec=grid_spec,
        compiler_params=pltpu.CompilerParams(
            dimension_semantics=("parallel",),      # v7x: split batch over 2 TCs
            vmem_limit_bytes=48 * 1024 * 1024,      # headroom even at TB=8192
        ),
    )(x_packed,
      params["w1"], params["b1"], params["w2"], params["b2"],
      params["w3_row"], params["b3"])

    return out[:B]


def init_params(key, num_users, num_items, num_brands, vocab_size, E, D):
    ks = jax.random.split(key, 10)
    f_in = 3 * E + 1 + D               # PyTorch fc1 fan-in (torch.cat order)
    K_pad = _round_up(f_in, 128)

    def lin(k, fan_in, shape):
        bound = 1.0 / jnp.sqrt(fan_in)
        return jax.random.uniform(k, shape, jnp.float32, -bound, bound)

    # fc1 weight in (in, out) layout, rows already in the torch.cat order
    # [user | item | brand | price | desc_mean]; zero-pad K up to K_pad.
    w1_full = lin(ks[4], f_in, (f_in, 128))
    w1_pad = jnp.concatenate(
        [w1_full, jnp.zeros((K_pad - f_in, 128), jnp.float32)], axis=0)

    w2 = lin(ks[6], 128, (128, 64))
    b2 = lin(ks[7], 128, (1, 64))
    w3 = lin(ks[8], 64, (64, 1))
    b3 = lin(ks[9], 64, (1, 1))

    # Zero-pad fc2 out-dim 64 -> 128 (inert columns) for lane-dense vregs.
    w2_pad = jnp.concatenate([w2, jnp.zeros((128, 64), jnp.float32)], axis=1)
    b2_pad = jnp.concatenate([b2, jnp.zeros((1, 64), jnp.float32)], axis=1)
    w3_row = jnp.concatenate([w3.T, jnp.zeros((1, 64), jnp.float32)], axis=1)

    return {
        # bf16 storage for tables / matmul operands (MXU bf16 rate, half the
        # HBM bytes); biases and the fc3 row stay f32 (VPU math in f32).
        "user_emb": jax.random.normal(ks[0], (num_users, E)).astype(jnp.bfloat16),
        "item_emb": jax.random.normal(ks[1], (num_items, E)).astype(jnp.bfloat16),
        "brand_emb": jax.random.normal(ks[2], (num_brands, E)).astype(jnp.bfloat16),
        "desc_emb": jax.random.normal(ks[3], (vocab_size, D)).astype(jnp.bfloat16),
        "w1": w1_pad.astype(jnp.bfloat16),   # (K_pad, 128)
        "b1": lin(ks[5], f_in, (1, 128)),    # f32
        "w2": w2_pad.astype(jnp.bfloat16),   # (128, 128)
        "b2": b2_pad,                        # f32 (1, 128)
        "w3_row": w3_row,                    # f32 (1, 128)
        "b3": b3,                            # f32 (1, 1)
    }


if __name__ == "__main__":
    # small, deterministic problem sizes
    B = 8            # batch
    E = 32           # embedding_size
    D = 16           # description_embedding_size
    L = 8            # description sequence length
    NUM_USERS, NUM_ITEMS, NUM_BRANDS, VOCAB = 50, 40, 10, 100

    key = jax.random.PRNGKey(0)
    k_params, k_u, k_i, k_b, k_p, k_d = jax.random.split(key, 6)

    params = init_params(k_params, NUM_USERS, NUM_ITEMS, NUM_BRANDS, VOCAB, E, D)

    user = jax.random.randint(k_u, (B,), 0, NUM_USERS, dtype=jnp.int32)
    item = jax.random.randint(k_i, (B,), 0, NUM_ITEMS, dtype=jnp.int32)
    brand = jax.random.randint(k_b, (B,), 0, NUM_BRANDS, dtype=jnp.int32)
    price = jax.random.uniform(k_p, (B,), jnp.float32, 0.0, 100.0)
    description = jax.random.randint(k_d, (B, L), 0, VOCAB, dtype=jnp.int32)

    fwd = jax.jit(recommendation_forward)
    out = jax.block_until_ready(fwd(params, user, item, brand, price, description))

    # sanity: correct shape, finite, within sigmoid range
    assert out.shape == (B, 1)
    assert bool(jnp.all(jnp.isfinite(out)))
    assert bool(jnp.all((out >= 0.0) & (out <= 1.0)))

    print("KERNEL_OK")
</pallas_src>

<mosaic_0001>
module attributes {stable_mosaic.version = 11 : i64} {
  func.func @recommendation_mlp_kernel(%arg0: i32, %arg1: memref<8x128xbf16, #tpu.memory_space<vmem>>, %arg2: memref<128x128xbf16, #tpu.memory_space<vmem>>, %arg3: memref<1x128xf32, #tpu.memory_space<vmem>>, %arg4: memref<128x128xbf16, #tpu.memory_space<vmem>>, %arg5: memref<1x128xf32, #tpu.memory_space<vmem>>, %arg6: memref<1x128xf32, #tpu.memory_space<vmem>>, %arg7: memref<1x1xf32, #tpu.memory_space<vmem>>, %arg8: memref<8x1xf32, #tpu.memory_space<vmem>>) attributes {dimension_semantics = [#tpu.dimension_semantics<parallel>], iteration_bounds = array<i64: 1>, scalar_prefetch = 0 : i64, scratch_operands = 0 : i64, tpu.core_type = #tpu.core_type<tc>, window_params = [{transform_indices = @transform_0, window_bounds = array<i64: 8, 128>}, {pipeline_mode = #tpu.pipeline_mode<synchronous>, transform_indices = @transform_1, window_bounds = array<i64: 128, 128>}, {pipeline_mode = #tpu.pipeline_mode<synchronous>, transform_indices = @transform_2, window_bounds = array<i64: 1, 128>}, {pipeline_mode = #tpu.pipeline_mode<synchronous>, transform_indices = @transform_3, window_bounds = array<i64: 128, 128>}, {pipeline_mode = #tpu.pipeline_mode<synchronous>, transform_indices = @transform_4, window_bounds = array<i64: 1, 128>}, {pipeline_mode = #tpu.pipeline_mode<synchronous>, transform_indices = @transform_5, window_bounds = array<i64: 1, 128>}, {pipeline_mode = #tpu.pipeline_mode<synchronous>, transform_indices = @transform_6, window_bounds = array<i64: 1, 1>}, {transform_indices = @transform_7, window_bounds = array<i64: 8, 1>}]} {
    %c0 = arith.constant 0 : index
    %c0_0 = arith.constant 0 : index
    %0 = vector.load %arg1[%c0, %c0_0] : memref<8x128xbf16, #tpu.memory_space<vmem>>, vector<8x128xbf16>
    %c0_1 = arith.constant 0 : index
    %c0_2 = arith.constant 0 : index
    %1 = vector.load %arg2[%c0_1, %c0_2] : memref<128x128xbf16, #tpu.memory_space<vmem>>, vector<128x128xbf16>
    %cst = arith.constant dense<0.000000e+00> : vector<8x128xf32>
    %2 = tpu.matmul %0, %1, %cst {dimension_numbers = #tpu.dot_dimension_numbers<[1], [0], [0], [1], [0, 0, 1, 1], [], []>} : vector<8x128xbf16>, vector<128x128xbf16>, vector<8x128xf32> -> vector<8x128xf32>
    %c0_3 = arith.constant 0 : index
    %c0_4 = arith.constant 0 : index
    %3 = vector.load %arg3[%c0_3, %c0_4] : memref<1x128xf32, #tpu.memory_space<vmem>>, vector<1x128xf32>
    %4 = vector.broadcast %3 : vector<1x128xf32> to vector<8x128xf32>
    %5 = arith.addf %2, %4 : vector<8x128xf32>
    %cst_5 = arith.constant 0.000000e+00 : f32
    %6 = vector.broadcast %cst_5 : f32 to vector<8x128xf32>
    %7 = arith.maximumf %5, %6 : vector<8x128xf32>
    %8 = arith.truncf %7 : vector<8x128xf32> to vector<8x128xbf16>
    %c0_6 = arith.constant 0 : index
    %c0_7 = arith.constant 0 : index
    %9 = vector.load %arg4[%c0_6, %c0_7] : memref<128x128xbf16, #tpu.memory_space<vmem>>, vector<128x128xbf16>
    %cst_8 = arith.constant dense<0.000000e+00> : vector<8x128xf32>
    %10 = tpu.matmul %8, %9, %cst_8 {dimension_numbers = #tpu.dot_dimension_numbers<[1], [0], [0], [1], [0, 0, 1, 1], [], []>} : vector<8x128xbf16>, vector<128x128xbf16>, vector<8x128xf32> -> vector<8x128xf32>
    %c0_9 = arith.constant 0 : index
    %c0_10 = arith.constant 0 : index
    %11 = vector.load %arg5[%c0_9, %c0_10] : memref<1x128xf32, #tpu.memory_space<vmem>>, vector<1x128xf32>
    %12 = vector.broadcast %11 : vector<1x128xf32> to vector<8x128xf32>
    %13 = arith.addf %10, %12 : vector<8x128xf32>
    %cst_11 = arith.constant 0.000000e+00 : f32
    %14 = vector.broadcast %cst_11 : f32 to vector<8x128xf32>
    %15 = arith.maximumf %13, %14 : vector<8x128xf32>
    %c0_12 = arith.constant 0 : index
    %c0_13 = arith.constant 0 : index
    %16 = vector.load %arg6[%c0_12, %c0_13] : memref<1x128xf32, #tpu.memory_space<vmem>>, vector<1x128xf32>
    %17 = vector.broadcast %16 : vector<1x128xf32> to vector<8x128xf32>
    %18 = arith.mulf %15, %17 : vector<8x128xf32>
    %cst_14 = arith.constant dense<0.000000e+00> : vector<8xf32>
    %19 = vector.multi_reduction <add>, %18, %cst_14 [1] : vector<8x128xf32> to vector<8xf32>
    %20 = vector.shape_cast %19 : vector<8xf32> to vector<8x1xf32>
    %c0_15 = arith.constant 0 : index
    %c0_16 = arith.constant 0 : index
    %21 = vector.load %arg7[%c0_15, %c0_16] : memref<1x1xf32, #tpu.memory_space<vmem>>, vector<1x1xf32>
    %22 = vector.broadcast %21 : vector<1x1xf32> to vector<8x1xf32>
    %23 = arith.addf %20, %22 : vector<8x1xf32>
    %24 = arith.negf %23 : vector<8x1xf32>
    %25 = math.exp %24 : vector<8x1xf32>
    %cst_17 = arith.constant 1.000000e+00 : f32
    %26 = vector.broadcast %cst_17 : f32 to vector<8x1xf32>
    %27 = arith.addf %26, %25 : vector<8x1xf32>
    %28 = arith.divf %26, %27 : vector<8x1xf32>
    %c0_18 = arith.constant 0 : index
    %c0_19 = arith.constant 0 : index
    %29 = vector.load %arg8[%c0_18, %c0_19] : memref<8x1xf32, #tpu.memory_space<vmem>>, vector<8x1xf32>
    tpu.vector_store %arg8[%c0_18, %c0_19], %28 {strides = array<i32>} : memref<8x1xf32, #tpu.memory_space<vmem>>, vector<8x1xf32>,
    return
  }
  func.func @transform_0(%arg0: i32) -> (i32, i32) {
    %c0_i32 = arith.constant 0 : i32
    %c0_i32_0 = arith.constant 0 : i32
    return %arg0, %c0_i32 : i32, i32
  }
  func.func @transform_1(%arg0: i32) -> (i32, i32) {
    %c0_i32 = arith.constant 0 : i32
    %c0_i32_0 = arith.constant 0 : i32
    %c0_i32_1 = arith.constant 0 : i32
    return %c0_i32, %c0_i32_0 : i32, i32
  }
  func.func @transform_2(%arg0: i32) -> (i32, i32) {
    %c0_i32 = arith.constant 0 : i32
    %c0_i32_0 = arith.constant 0 : i32
    %c0_i32_1 = arith.constant 0 : i32
    return %c0_i32, %c0_i32_0 : i32, i32
  }
  func.func @transform_3(%arg0: i32) -> (i32, i32) {
    %c0_i32 = arith.constant 0 : i32
    %c0_i32_0 = arith.constant 0 : i32
    %c0_i32_1 = arith.constant 0 : i32
    return %c0_i32, %c0_i32_0 : i32, i32
  }
  func.func @transform_4(%arg0: i32) -> (i32, i32) {
    %c0_i32 = arith.constant 0 : i32
    %c0_i32_0 = arith.constant 0 : i32
    %c0_i32_1 = arith.constant 0 : i32
    return %c0_i32, %c0_i32_0 : i32, i32
  }
  func.func @transform_5(%arg0: i32) -> (i32, i32) {
    %c0_i32 = arith.constant 0 : i32
    %c0_i32_0 = arith.constant 0 : i32
    %c0_i32_1 = arith.constant 0 : i32
    return %c0_i32, %c0_i32_0 : i32, i32
  }
  func.func @transform_6(%arg0: i32) -> (i32, i32) {
    %c0_i32 = arith.constant 0 : i32
    %c0_i32_0 = arith.constant 0 : i32
    %c0_i32_1 = arith.constant 0 : i32
    return %c0_i32, %c0_i32_0 : i32, i32
  }
  func.func @transform_7(%arg0: i32) -> (i32, i32) {
    %c0_i32 = arith.constant 0 : i32
    %c0_i32_0 = arith.constant 0 : i32
    return %arg0, %c0_i32 : i32, i32
  }
}

</mosaic_0001>

<bundles_post_ra>
// kernel: recommendation_forward.1
= control target key start
LH: loop header
LB: loop body
LE: loop exit
PB: predicated region body
PF: predicated region fallthrough
CT: control target
= control target key end

     0   :  { %vm225_vm3 = vcmask 7168   ;;  %s426_s1 = inlined_call_operand.vmem [shape: bf16[128,128], index: 1, kind: input, shape index: {}]   ;;  %s427_s3 = inlined_call_operand.vmem [shape: bf16[128,128], index: 3, kind: input, shape index: {}]   ;;  %s428_s2 = inlined_call_operand.vmem [shape: f32[1,128], index: 2, kind: input, shape index: {}]   ;;  %s429_s0 = inlined_call_operand.vmem [shape: bf16[8,128], index: 0, kind: input, shape index: {}]   ;;  %s430_s4 = inlined_call_operand.vmem [shape: f32[1,128], index: 4, kind: input, shape index: {}]   ;;  %s431_s5 = inlined_call_operand.vmem [shape: f32[1,128], index: 5, kind: input, shape index: {}]   ;;  %s432_s6 = inlined_call_operand.<no memory space> [shape: f32[1,1], index: 6, kind: input, shape index: {}]   ;;  %s433_s7 = inlined_call_operand.vmem [shape: f32[8,1], index: 7, kind: output, shape index: {}]  }
   0x1   :  { %v303_v0 = vld [vmem:[%s426_s1 + $0x38] sm:$0xff]  ;;  %v302_v1 = vld [vmem:[%s426_s1 + $0x30] sm:$0xff]  ;;  %v301_v4 = vld [vmem:[%s426_s1 + $0x28] sm:$0xff]  ;;  %v12_v23 = vstv %s432_s6 }
   0x2   :  { %97 = vmatpush.bf16.msra.mxu0 %v303_v0  ;;  %v311_v2 = vld [vmem:[%s427_s3 + $0x38] sm:$0xff]  ;;  %v310_v3 = vld [vmem:[%s427_s3 + $0x30] sm:$0xff]  ;;  %v309_v5 = vld [vmem:[%s427_s3 + $0x28] sm:$0xff]  ;;  %13 = vst [vmem:[#allocation2] sm:$0x1] %v12_v23 }
   0x3   :  { %180 = vmatpush.bf16.msra.mxu1 %v311_v2  ;;  %v300_v6 = vld [vmem:[%s426_s1 + $0x20] sm:$0xff]  ;;  %v299_v8 = vld [vmem:[%s426_s1 + $0x18] sm:$0xff]  ;;  %v298_v10 = vld [vmem:[%s426_s1 + $0x10] sm:$0xff] }
   0x4   :  { %v308_v7 = vld [vmem:[%s427_s3 + $0x20] sm:$0xff]  ;;  %v307_v9 = vld [vmem:[%s427_s3 + $0x18] sm:$0xff]  ;;  %v306_v11 = vld [vmem:[%s427_s3 + $0x10] sm:$0xff] }
   0x5   :  { %v297_v12 = vld [vmem:[%s426_s1 + $0x8] sm:$0xff]  ;;  %v296_v13 = vld [vmem:[%s426_s1] sm:$0xff] }
   0x6   :  { %98 = vmatpush.bf16.msra.mxu0 %v302_v1  ;;  %v28_v14 = vld [vmem:[%s429_s0] sm:$0xf]  ;;  %v305_v15 = vld [vmem:[%s427_s3 + $0x8] sm:$0xff] }
   0x7   :  { %181 = vmatpush.bf16.msra.mxu1 %v310_v3  ;;  %v304_v16 = vld [vmem:[%s427_s3] sm:$0xff] }
   0x8   :  { %v312_v17 = vld [vmem:[%s428_s2] ss:$0 sm:$0xff] }
   0x9   :  { %v313_v24 = vld [vmem:[%s430_s4] ss:$0 sm:$0xff] }
   0xa   :  { %99 = vmatpush.bf16.msra.mxu0 %v301_v4  ;;  %v314_v27 = vld [vmem:[%s431_s5] ss:$0 sm:$0xff] }
   0xb   :  { %182 = vmatpush.bf16.msra.mxu1 %v309_v5  ;;  %v315_v31 = vld [vmem:[#allocation2] ss:$0 sm:$0xff] }
   0xe   :  { %100 = vmatpush.bf16.msra.mxu0 %v300_v6 }
   0xf   :  { %183 = vmatpush.bf16.msra.mxu1 %v308_v7 }
  0x12   :  { %101 = vmatpush.bf16.msra.mxu0 %v299_v8 }
  0x13   :  { %184 = vmatpush.bf16.msra.mxu1 %v307_v9 }
  0x16   :  { %102 = vmatpush.bf16.msra.mxu0 %v298_v10 }
  0x17   :  { %185 = vmatpush.bf16.msra.mxu1 %v306_v11 }
  0x1a   :  { %103 = vmatpush.bf16.msra.mxu0 %v297_v12 }
  0x1b   :  { %186 = vmatpush.bf16.msra.mxu1 %v305_v15 }
  0x1e   :  { %104 = vmatpush.bf16.msra.mxu0 %v296_v13 }
  0x1f   :  { %187 = vmatpush.bf16.msra.mxu1 %v304_v16 }
  0x21   :  { %105 = vmatmul.bf16.vlgmr.msra.gmra.mxu0 %v28_v14 }
  0x9e   :  { %v106_v18 = vpop.f32.mrf.mxu0 }
  0x9f   :  { %v107_v19 = vadd.f32 %v312_v17, %v106_v18 }
  0xa1   :  { %v110_v20 = vmax.f32 %v107_v19, 0.0 }
  0xa3   :  { %v111_v21 = vpack.c.bf16 %v110_v20, %v110_v20 }
  0xa5   :  { %188 = vmatmul.bf16.vlgmr.msra.gmra.mxu1 %v111_v21 }
  0xa6   :  { %v108_v22 = vpop.f32.mrf.mxu0 }
 0x122   :  { %v189_v25 = vpop.f32.mrf.mxu1 }
 0x123   :  { %v190_v26 = vadd.f32 %v313_v24, %v189_v25 }
 0x125   :  { %v193_v28 = vmax.f32 %v190_v26, 0.0 }
 0x127   :  { %v198_v29 = vmul.f32 %v314_v27, %v193_v28 }
 0x129   :  { %199 = vadd.xlane.f32.xlu0 %v198_v29 }
 0x12a   :  { %v191_v30 = vpop.f32.mrf.mxu1 }
 0x19c   :  { %v200_v32 = vpop.xlane.xlu0 %199 }
 0x19d   :  { %v205_v33 = vadd.f32 %v315_v31, %v200_v32 }
 0x19f   :  { %v295_v34 = vmul.f32 -1.442695, %v205_v33 }
 0x1a1   :  { %316 = vpow2.f32 %v295_v34 }
 0x1a7   :  { %v317_v35 = vpop.eup %316 }
 0x1a8   :  { %v209_v36 = vadd.f32 1.0, %v317_v35 }
 0x1aa   :  { %318 = vrcp.f32 %v209_v36  ;;  %v221_v40 = vand.u32 2147483648, %v209_v36  ;;  %v219_v42 = vand.u32 2147483647, %v209_v36  ;;  %vm215_vm1 = vweird.f32 %v209_v36 }
 0x1ac   :  { %v222_v44 = vor.u32 1.1754944e-38, %v221_v40  ;;  %vm220_vm4 = vcmp.eq.f32.partialorder %v219_v42, 8.507059e+37 }
 0x1b0   :  { %v319_v37 = vpop.eup %318 }
 0x1b1   :  { %v211_v38 = vmul.f32 %v319_v37, %v209_v36  ;;  %vm216_vm0 = vweird.f32 %v319_v37 }
 0x1b2   :  { %vm217_vm2 = vmor %vm215_vm1, %vm216_vm0 }
 0x1b3   :  { %v212_v39 = vsub.f32 1.0, %v211_v38 }
 0x1b5   :  { %v213_v41 = vmul.f32 %v319_v37, %v212_v39 }
 0x1b7   :  { %v214_v43 = vadd.f32 %v319_v37, %v213_v41 }
 0x1b9   :  { %v218_v45 = vsel %vm217_vm2, %v319_v37, %v214_v43 }
 0x1ba   :  { %v223_v46 = vsel %vm220_vm4, %v222_v44, %v218_v45 }
 0x1bb   :  { %226 = vst.msk [vmem:[%s433_s7] sm:$0xff] %vm225_vm3, %v223_v46 }

</bundles_post_ra>
